<compile_context>
chip_gen: v5e
topology: v5e:2x2
jax: 0.10.0
libtpu: 0.0.40
codegen_flags: <defaults>
</compile_context>

<pallas_src>
import math

import jax
import jax.numpy as jnp
from jax.experimental import pallas as pl
from jax.experimental.pallas import tpu as pltpu

_LANES = 128
_DEFAULT_SCOPED_VMEM = 32 * 1024 * 1024


def _round_up(x, m):
    return (x + m - 1) // m * m


def _sigmoid(x):
    # sigmoid(x) == 0.5 * tanh(0.5 * x) + 0.5 : one EUP op instead of exp+rcp.
    return 0.5 * jnp.tanh(0.5 * x) + 0.5


# ---------------------------------------------------------------------------
# Parameter glue: fold per-stripe PyTorch-layout params into fused weights.
# Call ONCE (hoist out of any time loop).
# ---------------------------------------------------------------------------
def prepare_striped_lstm_params(w_ih, w_hh, b_ih, b_hh, num_stripes,
                                matmul_dtype=jnp.bfloat16):
    """Args:
         w_ih : (ns, 4*S, In)   w_hh : (ns, 4*S, S)
         b_ih : (ns, 4*S)       b_hh : (ns, 4*S)
       Returns:
         wx_big : (In, 4*GP)  x-path weight  (matmul dtype)
         wh_big : (H,  4*GP)  h-path weight, block-diagonal per gate
         b_big  : (1,  4*GP)  pre-summed b_ih + b_hh, float32
       H = ns*S, GP = round_up(H, 128).  Columns are gate-major, lane-aligned,
       stripes contiguous inside each gate slab (matches the (B, H) state
       layout column-for-column).  Padded columns [H, GP) are zero everywhere
       (weights AND bias) and the kernel's gate slices stop at H.
    """
    ns = num_stripes
    In = w_ih.shape[-1]
    S = w_hh.shape[-1]
    H = ns * S
    GP = _round_up(H, _LANES)
    mm_dtype = matmul_dtype if matmul_dtype is not None else w_ih.dtype

    w_ih_g = w_ih.reshape(ns, 4, S, In)        # (stripe, gate, S, In)
    w_hh_g = w_hh.reshape(ns, 4, S, S)         # (stripe, gate, S, S)
    b_sum = (b_ih + b_hh).reshape(ns, 4, S)    # pre-summed biases

    wx_blocks, wh_blocks, b_blocks = [], [], []
    for g in range(4):
        # x-path: each stripe's own W_ih^T side by side (NOT replicated).
        top = jnp.concatenate([w_ih_g[s, g].T for s in range(ns)], axis=1)
        wx_blocks.append(jnp.pad(top, ((0, 0), (0, GP - H))))
        # h-path: W_hh^T block-diagonal across stripes.
        diag = jax.scipy.linalg.block_diag(*[w_hh_g[s, g].T for s in range(ns)])
        wh_blocks.append(jnp.pad(diag, ((0, 0), (0, GP - H))))
        bias = jnp.concatenate([b_sum[s, g] for s in range(ns)], axis=0)
        b_blocks.append(jnp.pad(bias, (0, GP - H)))

    wx_big = jnp.concatenate(wx_blocks, axis=1).astype(mm_dtype)
    wh_big = jnp.concatenate(wh_blocks, axis=1).astype(mm_dtype)
    b_big = jnp.concatenate(b_blocks, axis=0).reshape(1, 4 * GP)
    return wx_big, wh_big, b_big.astype(jnp.float32)


# ---------------------------------------------------------------------------
# Single-step kernel (one cell application, matches the module's forward()).
# ---------------------------------------------------------------------------
def _striped_lstm_step_kernel(x_ref, h_ref, c_ref, wx_ref, wh_ref, b_ref,
                              h1_ref, c1_ref):
    H = h1_ref.shape[-1]
    GP = b_ref.shape[-1] // 4
    mm = wx_ref.dtype

    # Two lane-aligned, MXU-accumulating dots (no concat / relayout).
    gates = (jnp.dot(x_ref[...].astype(mm), wx_ref[...],
                     preferred_element_type=jnp.float32)
             + jnp.dot(h_ref[...].astype(mm), wh_ref[...],
                       preferred_element_type=jnp.float32)
             + b_ref[...])

    i_g = _sigmoid(gates[:, 0 * GP:0 * GP + H])
    f_g = _sigmoid(gates[:, 1 * GP:1 * GP + H])
    g_g = jnp.tanh(gates[:, 2 * GP:2 * GP + H])
    o_g = _sigmoid(gates[:, 3 * GP:3 * GP + H])

    c1 = f_g * c_ref[...].astype(jnp.float32) + i_g * g_g
    c1_ref[...] = c1.astype(c1_ref.dtype)
    h1_ref[...] = (o_g * jnp.tanh(c1)).astype(h1_ref.dtype)


def striped_lstm_cell_fused(x, h0, c0, wx_big, wh_big, b_big):
    """One cell step with pre-fused params.  h1 has h0.dtype; c1 is float32."""
    B, H = h0.shape
    vmem = pl.BlockSpec(memory_space=pltpu.MemorySpace.VMEM)
    h1, c1 = pl.pallas_call(
        _striped_lstm_step_kernel,
        out_shape=(jax.ShapeDtypeStruct((B, H), h0.dtype),
                   jax.ShapeDtypeStruct((B, H), jnp.float32)),
        in_specs=[vmem] * 6,
        out_specs=(vmem, vmem),
    )(x, h0, c0, wx_big, wh_big, b_big)
    return h1, c1


def striped_lstm_cell(x, h0, c0, w_ih, w_hh, b_ih, b_hh, num_stripes,
                      matmul_dtype=jnp.bfloat16):
    """Convenience wrapper matching the PyTorch module's parameter layout."""
    wx, wh, b = prepare_striped_lstm_params(w_ih, w_hh, b_ih, b_hh, num_stripes,
                                            matmul_dtype=matmul_dtype)
    return striped_lstm_cell_fused(x, h0, c0, wx, wh, b)


# ---------------------------------------------------------------------------
# Weight-stationary sequence kernel: grid over T, weights resident in VMEM,
# h/c carried in f32 scratch, h written per step, c finalized on last step.
# ---------------------------------------------------------------------------
def _striped_lstm_seq_kernel(x_ref, h0_ref, c0_ref, wx_ref, wh_ref, b_ref,
                             hseq_ref, cT_ref, h_sc, c_sc):
    t = pl.program_id(0)
    H = hseq_ref.shape[-1]
    GP = b_ref.shape[-1] // 4
    mm = wx_ref.dtype

    @pl.when(t == 0)
    def _():
        h_sc[...] = h0_ref[...].astype(jnp.float32)
        c_sc[...] = c0_ref[...].astype(jnp.float32)

    gates = (jnp.dot(x_ref[0].astype(mm), wx_ref[...],
                     preferred_element_type=jnp.float32)
             + jnp.dot(h_sc[...].astype(mm), wh_ref[...],
                       preferred_element_type=jnp.float32)
             + b_ref[...])

    i_g = _sigmoid(gates[:, 0 * GP:0 * GP + H])
    f_g = _sigmoid(gates[:, 1 * GP:1 * GP + H])
    g_g = jnp.tanh(gates[:, 2 * GP:2 * GP + H])
    o_g = _sigmoid(gates[:, 3 * GP:3 * GP + H])

    c1 = f_g * c_sc[...] + i_g * g_g
    h1 = o_g * jnp.tanh(c1)
    c_sc[...] = c1                        # cell state stays f32 across steps
    h_sc[...] = h1
    hseq_ref[0] = h1.astype(hseq_ref.dtype)

    @pl.when(t == pl.num_programs(0) - 1)
    def _():
        cT_ref[...] = c1.astype(cT_ref.dtype)


def _estimate_seq_vmem_bytes(B, In, H, GP, x_dtype, state_dtype, mm_dtype):
    mm = jnp.dtype(mm_dtype).itemsize
    xd = jnp.dtype(x_dtype).itemsize
    sd = jnp.dtype(state_dtype).itemsize
    weights = (In + H) * 4 * GP * mm + 4 * GP * 4            # wx + wh + bias
    states = 2 * B * H * sd + 2 * B * H * 4                  # h0/c0 + scratch
    streamed = 2 * B * In * xd + 2 * B * H * sd              # double-buffered
    return weights + states + streamed + B * H * 4


def striped_lstm_sequence_fused(xs, h0, c0, wx_big, wh_big, b_big):
    """Run T recurrent steps in one pallas_call (weights loaded once).

    Args:   xs (T, B, In), h0/c0 (B, H), fused params from prepare_*().
    Returns (h_seq (T, B, H) in h0.dtype, h_T (B, H), c_T (B, H) float32).
    """
    T, B, In = xs.shape
    H = h0.shape[-1]
    GP = b_big.shape[-1] // 4

    est = _estimate_seq_vmem_bytes(B, In, H, GP, xs.dtype, h0.dtype,
                                   wx_big.dtype)
    cp_kwargs = {}
    if 2 * est > _DEFAULT_SCOPED_VMEM:
        cp_kwargs["vmem_limit_bytes"] = min(128 * 1024 * 1024, 2 * est)

    grid_spec = pltpu.PrefetchScalarGridSpec(
        num_scalar_prefetch=0,
        grid=(T,),
        in_specs=[
            pl.BlockSpec((1, B, In), lambda t: (t, 0, 0)),   # x, per step
            pl.BlockSpec((B, H), lambda t: (0, 0)),          # h0 (resident)
            pl.BlockSpec((B, H), lambda t: (0, 0)),          # c0 (resident)
            pl.BlockSpec((In, 4 * GP), lambda t: (0, 0)),    # wx (resident)
            pl.BlockSpec((H, 4 * GP), lambda t: (0, 0)),     # wh (resident)
            pl.BlockSpec((1, 4 * GP), lambda t: (0, 0)),     # bias (resident)
        ],
        out_specs=(
            pl.BlockSpec((1, B, H), lambda t: (t, 0, 0)),    # h per step
            pl.BlockSpec((B, H), lambda t: (0, 0)),          # final c
        ),
        scratch_shapes=[pltpu.VMEM((B, H), jnp.float32),     # h carry (f32)
                        pltpu.VMEM((B, H), jnp.float32)],    # c carry (f32)
    )

    h_seq, c_T = pl.pallas_call(
        _striped_lstm_seq_kernel,
        out_shape=(jax.ShapeDtypeStruct((T, B, H), h0.dtype),
                   jax.ShapeDtypeStruct((B, H), jnp.float32)),
        grid_spec=grid_spec,
        compiler_params=pltpu.CompilerParams(
            dimension_semantics=("arbitrary",), **cp_kwargs),
    )(xs, h0, c0, wx_big, wh_big, b_big)
    return h_seq, h_seq[-1], c_T


# ---------------------------------------------------------------------------
# Pure-JAX reference mirroring the PyTorch forward exactly.
# ---------------------------------------------------------------------------
def striped_lstm_ref_step(x, h0, c0, w_ih, w_hh, b_ih, b_hh, num_stripes):
    S = h0.shape[1] // num_stripes
    h1, c1 = [], []
    for i in range(num_stripes):
        hs = h0[:, i * S:(i + 1) * S]
        cs = c0[:, i * S:(i + 1) * S]
        gates = x @ w_ih[i].T + b_ih[i] + hs @ w_hh[i].T + b_hh[i]
        ig, fg, gg, og = jnp.split(gates, 4, axis=1)
        c1s = jax.nn.sigmoid(fg) * cs + jax.nn.sigmoid(ig) * jnp.tanh(gg)
        h1s = jax.nn.sigmoid(og) * jnp.tanh(c1s)
        h1.append(h1s)
        c1.append(c1s)
    return jnp.concatenate(h1, axis=1), jnp.concatenate(c1, axis=1)


def init_params(key, input_size, hidden_size, num_stripes, dtype=jnp.float32):
    """Matches reset_parameters(): kaiming_uniform(a=sqrt(5)) on weights,
    BOTH biases drawn with the bound from weight_ih's fan_in (as in the
    original module)."""
    S = hidden_size // num_stripes
    k_wih, k_whh, k_bih, k_bhh = jax.random.split(key, 4)
    bound_ih = 1.0 / math.sqrt(input_size)
    bound_hh = 1.0 / math.sqrt(S)
    w_ih = jax.random.uniform(k_wih, (num_stripes, 4 * S, input_size),
                              dtype, -bound_ih, bound_ih)
    w_hh = jax.random.uniform(k_whh, (num_stripes, 4 * S, S),
                              dtype, -bound_hh, bound_hh)
    b_ih = jax.random.uniform(k_bih, (num_stripes, 4 * S),
                              dtype, -bound_ih, bound_ih)
    b_hh = jax.random.uniform(k_bhh, (num_stripes, 4 * S),
                              dtype, -bound_ih, bound_ih)
    return w_ih, w_hh, b_ih, b_hh


if __name__ == "__main__":
    input_size = 100
    hidden_size = 200
    num_stripes = 4
    batch = 2
    seq_len = 8

    key = jax.random.PRNGKey(0)
    k_x, k_xs, k_h, k_c, k_p = jax.random.split(key, 5)

    x = jax.random.normal(k_x, (batch, input_size), jnp.float32)
    xs = jax.random.normal(k_xs, (seq_len, batch, input_size), jnp.float32)
    h0 = jax.random.normal(k_h, (batch, hidden_size), jnp.float32)
    c0 = jax.random.normal(k_c, (batch, hidden_size), jnp.float32)
    w_ih, w_hh, b_ih, b_hh = init_params(k_p, input_size, hidden_size,
                                         num_stripes)

    # Reference (PyTorch-equivalent) single step.
    h1_ref, c1_ref = striped_lstm_ref_step(x, h0, c0, w_ih, w_hh, b_ih, b_hh,
                                           num_stripes)

    # --- single step, f32 matmul operands: exact check -----------------------
    wx32, wh32, b32 = prepare_striped_lstm_params(
        w_ih, w_hh, b_ih, b_hh, num_stripes, matmul_dtype=jnp.float32)
    h1, c1 = striped_lstm_cell_fused(x, h0, c0, wx32, wh32, b32)
    jax.block_until_ready((h1, c1))
    assert jnp.allclose(h1, h1_ref, atol=1e-4, rtol=1e-4)
    assert jnp.allclose(c1, c1_ref, atol=1e-4, rtol=1e-4)

    # --- single step, default bf16 matmul operands (looser tolerance) --------
    wxb, whb, bb = prepare_striped_lstm_params(w_ih, w_hh, b_ih, b_hh,
                                               num_stripes)
    h1b, c1b = striped_lstm_cell_fused(x, h0, c0, wxb, whb, bb)
    jax.block_until_ready((h1b, c1b))
    assert jnp.allclose(h1b, h1_ref, atol=3e-2, rtol=3e-2)
    assert jnp.allclose(c1b, c1_ref, atol=3e-2, rtol=3e-2)

    # --- weight-stationary sequence kernel (f32, exact check) ----------------
    h_seq, h_T, c_T = striped_lstm_sequence_fused(xs, h0, c0, wx32, wh32, b32)
    jax.block_until_ready((h_seq, h_T, c_T))

    h_r, c_r = h0, c0
    hs_ref = []
    for t in range(seq_len):
        h_r, c_r = striped_lstm_ref_step(xs[t], h_r, c_r, w_ih, w_hh,
                                         b_ih, b_hh, num_stripes)
        hs_ref.append(h_r)
    hs_ref = jnp.stack(hs_ref, axis=0)
    assert jnp.allclose(h_seq, hs_ref, atol=1e-4, rtol=1e-4)
    assert jnp.allclose(h_T, h_r, atol=1e-4, rtol=1e-4)
    assert jnp.allclose(c_T, c_r, atol=1e-4, rtol=1e-4)

    print("KERNEL_OK")
</pallas_src>

<mosaic_0001>
module attributes {stable_mosaic.version = 11 : i64} {
  func.func @_striped_lstm_step_kernel(%arg0: memref<2x100xf32, #tpu.memory_space<vmem>>, %arg1: memref<2x200xf32, #tpu.memory_space<vmem>>, %arg2: memref<2x200xf32, #tpu.memory_space<vmem>>, %arg3: memref<100x1024xf32, #tpu.memory_space<vmem>>, %arg4: memref<200x1024xf32, #tpu.memory_space<vmem>>, %arg5: memref<1x1024xf32, #tpu.memory_space<vmem>>, %arg6: memref<2x200xf32, #tpu.memory_space<vmem>>, %arg7: memref<2x200xf32, #tpu.memory_space<vmem>>) attributes {dimension_semantics = [], scalar_prefetch = 0 : i64, scratch_operands = 0 : i64, tpu.core_type = #tpu.core_type<tc>} {
    %c0 = arith.constant 0 : index
    %c0_0 = arith.constant 0 : index
    %0 = vector.load %arg0[%c0, %c0_0] : memref<2x100xf32, #tpu.memory_space<vmem>>, vector<2x100xf32>
    %c0_1 = arith.constant 0 : index
    %c0_2 = arith.constant 0 : index
    %1 = vector.load %arg3[%c0_1, %c0_2] : memref<100x1024xf32, #tpu.memory_space<vmem>>, vector<100x1024xf32>
    %cst = arith.constant dense<0.000000e+00> : vector<2x1024xf32>
    %2 = tpu.matmul %0, %1, %cst {dimension_numbers = #tpu.dot_dimension_numbers<[1], [0], [0], [1], [0, 0, 1, 1], [], []>} : vector<2x100xf32>, vector<100x1024xf32>, vector<2x1024xf32> -> vector<2x1024xf32>
    %c0_3 = arith.constant 0 : index
    %c0_4 = arith.constant 0 : index
    %3 = vector.load %arg1[%c0_3, %c0_4] : memref<2x200xf32, #tpu.memory_space<vmem>>, vector<2x200xf32>
    %c0_5 = arith.constant 0 : index
    %c0_6 = arith.constant 0 : index
    %4 = vector.load %arg4[%c0_5, %c0_6] : memref<200x1024xf32, #tpu.memory_space<vmem>>, vector<200x1024xf32>
    %cst_7 = arith.constant dense<0.000000e+00> : vector<2x1024xf32>
    %5 = tpu.matmul %3, %4, %cst_7 {dimension_numbers = #tpu.dot_dimension_numbers<[1], [0], [0], [1], [0, 0, 1, 1], [], []>} : vector<2x200xf32>, vector<200x1024xf32>, vector<2x1024xf32> -> vector<2x1024xf32>
    %6 = arith.addf %2, %5 : vector<2x1024xf32>
    %c0_8 = arith.constant 0 : index
    %c0_9 = arith.constant 0 : index
    %7 = vector.load %arg5[%c0_8, %c0_9] : memref<1x1024xf32, #tpu.memory_space<vmem>>, vector<1x1024xf32>
    %8 = vector.broadcast %7 : vector<1x1024xf32> to vector<2x1024xf32>
    %9 = arith.addf %6, %8 : vector<2x1024xf32>
    %10 = vector.extract_strided_slice %9 {offsets = [0, 0], sizes = [2, 200], strides = [1, 1]} : vector<2x1024xf32> to vector<2x200xf32>
    %cst_10 = arith.constant 5.000000e-01 : f32
    %11 = vector.broadcast %cst_10 : f32 to vector<2x200xf32>
    %12 = arith.mulf %11, %10 : vector<2x200xf32>
    %13 = math.tanh %12 : vector<2x200xf32>
    %cst_11 = arith.constant 5.000000e-01 : f32
    %14 = vector.broadcast %cst_11 : f32 to vector<2x200xf32>
    %15 = arith.mulf %14, %13 : vector<2x200xf32>
    %cst_12 = arith.constant 5.000000e-01 : f32
    %16 = vector.broadcast %cst_12 : f32 to vector<2x200xf32>
    %17 = arith.addf %15, %16 : vector<2x200xf32>
    %18 = vector.extract_strided_slice %9 {offsets = [0, 256], sizes = [2, 200], strides = [1, 1]} : vector<2x1024xf32> to vector<2x200xf32>
    %cst_13 = arith.constant 5.000000e-01 : f32
    %19 = vector.broadcast %cst_13 : f32 to vector<2x200xf32>
    %20 = arith.mulf %19, %18 : vector<2x200xf32>
    %21 = math.tanh %20 : vector<2x200xf32>
    %cst_14 = arith.constant 5.000000e-01 : f32
    %22 = vector.broadcast %cst_14 : f32 to vector<2x200xf32>
    %23 = arith.mulf %22, %21 : vector<2x200xf32>
    %cst_15 = arith.constant 5.000000e-01 : f32
    %24 = vector.broadcast %cst_15 : f32 to vector<2x200xf32>
    %25 = arith.addf %23, %24 : vector<2x200xf32>
    %26 = vector.extract_strided_slice %9 {offsets = [0, 512], sizes = [2, 200], strides = [1, 1]} : vector<2x1024xf32> to vector<2x200xf32>
    %27 = math.tanh %26 : vector<2x200xf32>
    %28 = vector.extract_strided_slice %9 {offsets = [0, 768], sizes = [2, 200], strides = [1, 1]} : vector<2x1024xf32> to vector<2x200xf32>
    %cst_16 = arith.constant 5.000000e-01 : f32
    %29 = vector.broadcast %cst_16 : f32 to vector<2x200xf32>
    %30 = arith.mulf %29, %28 : vector<2x200xf32>
    %31 = math.tanh %30 : vector<2x200xf32>
    %cst_17 = arith.constant 5.000000e-01 : f32
    %32 = vector.broadcast %cst_17 : f32 to vector<2x200xf32>
    %33 = arith.mulf %32, %31 : vector<2x200xf32>
    %cst_18 = arith.constant 5.000000e-01 : f32
    %34 = vector.broadcast %cst_18 : f32 to vector<2x200xf32>
    %35 = arith.addf %33, %34 : vector<2x200xf32>
    %c0_19 = arith.constant 0 : index
    %c0_20 = arith.constant 0 : index
    %36 = vector.load %arg2[%c0_19, %c0_20] : memref<2x200xf32, #tpu.memory_space<vmem>>, vector<2x200xf32>
    %37 = arith.mulf %25, %36 : vector<2x200xf32>
    %38 = arith.mulf %17, %27 : vector<2x200xf32>
    %39 = arith.addf %37, %38 : vector<2x200xf32>
    %c0_21 = arith.constant 0 : index
    %c0_22 = arith.constant 0 : index
    %40 = vector.load %arg7[%c0_21, %c0_22] : memref<2x200xf32, #tpu.memory_space<vmem>>, vector<2x200xf32>
    tpu.vector_store %arg7[%c0_21, %c0_22], %39 {strides = array<i32>} : memref<2x200xf32, #tpu.memory_space<vmem>>, vector<2x200xf32>,
    %41 = math.tanh %39 : vector<2x200xf32>
    %42 = arith.mulf %35, %41 : vector<2x200xf32>
    %c0_23 = arith.constant 0 : index
    %c0_24 = arith.constant 0 : index
    %43 = vector.load %arg6[%c0_23, %c0_24] : memref<2x200xf32, #tpu.memory_space<vmem>>, vector<2x200xf32>
    tpu.vector_store %arg6[%c0_23, %c0_24], %42 {strides = array<i32>} : memref<2x200xf32, #tpu.memory_space<vmem>>, vector<2x200xf32>,
    return
  }
}

</mosaic_0001>

<bundles_post_ra>
// kernel: tpu_custom_call.1
= control target key start
LH: loop header
LB: loop body
LE: loop exit
PB: predicated region body
PF: predicated region fallthrough
CT: control target
= control target key end

     0   :  { %13 = vsyncpa [#allocation3], 0  ;;  %s1453_s0 = inlined_call_operand.hbm [shape: f32[2,100], index: 0, kind: input, shape index: {}]   ;;  %s1454_s1 = inlined_call_operand.hbm [shape: f32[2,200], index: 1, kind: input, shape index: {}]   ;;  %s1455_s2 = inlined_call_operand.hbm [shape: f32[2,200], index: 2, kind: input, shape index: {}]   ;;  %s1456_s3 = inlined_call_operand.hbm [shape: f32[100,1024], index: 3, kind: input, shape index: {}]   ;;  %s1457_s4 = inlined_call_operand.hbm [shape: f32[200,1024], index: 4, kind: input, shape index: {}]   ;;  %s1458_s5 = inlined_call_operand.hbm [shape: f32[1,1024], index: 5, kind: input, shape index: {}]   ;;  %s1459_s6 = inlined_call_operand.hbm [shape: f32[2,200], index: 6, kind: output, shape index: {0}]   ;;  %s1460_s7 = inlined_call_operand.hbm [shape: f32[2,200], index: 7, kind: output, shape index: {1}]  }
   0x1   :  { %14 = vsyncpa [#allocation6], 0 }
   0x2   :  { %15 = vsyncpa [#allocation9], 0 }
   0x3   :  { %16 = vsyncpa [#allocation12], 0 }
   0x4   :  { %17 = vsyncpa [#allocation4], 0  ;;  %s35_s26 = sshll.u32 %s1454_s1, 4  ;;  %s36_s26 = int_to_ptr.hbm [resolvable:$true] %s35_s26 }
   0x5   :  { %18 = vsyncpa [#allocation15], 0  ;;  %s1314_s27 = smov [#allocation5]   ;;  %s56_s8 = sshll.u32 %s1456_s3, 4  ;;  %s57_s8 = int_to_ptr.hbm [resolvable:$true] %s56_s8 }
   0x6   :  { %s37_s28 = sshll.u32 %s1314_s27, 4  ;;  %s1315_s9 = smov [#allocation8]   ;;  %s38_s28 = int_to_ptr.vmem [resolvable:$true] %s37_s28 }
   0x7   :  { %40 = dma.hbm_to_vmem [thread:$0]  %s36_s26, 64, %s38_s28, [#allocation6]  }
   0x8   :  { %s58_s10 = sshll.u32 %s1315_s9, 4  ;;  %s1316_s11 = smov 1024   ;;  %s59_s10 = int_to_ptr.vmem [resolvable:$true] %s58_s10 }
   0x9   :  { %s1317_s12 = smov 64   ;;  %s24_s1 = sshll.u32 %s1453_s0, 4  ;;  %s25_s1 = int_to_ptr.hbm [resolvable:$true] %s24_s1 }
   0xa   :  { %64 = dma.hbm_to_vmem [thread:$0]  %s57_s8, 13312, %s59_s10, [#allocation9], %s1316_s11, %s1316_s11, %s1317_s12  }
   0xb   :  { %s1318_s15 = smov [#allocation2]   ;;  %s46_s3 = sshll.u32 %s1455_s2, 4  ;;  %s47_s3 = int_to_ptr.hbm [resolvable:$true] %s46_s3 }
   0xc   :  { %s26_s16 = sshll.u32 %s1318_s15, 4  ;;  %s1319_s19 = smov [#allocation7]   ;;  %s27_s16 = int_to_ptr.vmem [resolvable:$true] %s26_s16 }
   0xd   :  { %29 = dma.hbm_to_vmem [thread:$0]  %s25_s1, 32, %s27_s16, [#allocation3]  }
   0xe   :  { %s48_s20 = sshll.u32 %s1319_s19, 4  ;;  %s69_s23 = sshll.u32 %s1457_s4, 4  ;;  %s49_s20 = int_to_ptr.vmem [resolvable:$true] %s48_s20  ;;  %s70_s23 = int_to_ptr.hbm [resolvable:$true] %s69_s23 }
   0xf   :  { %51 = dma.hbm_to_vmem [thread:$0]  %s47_s3, 64, %s49_s20, [#allocation6]  }
  0x10   :  { %s83_s25 = sshll.u32 %s1458_s5, 4  ;;  %s1320_s26 = smov [#allocation10]   ;;  %s84_s25 = int_to_ptr.hbm [resolvable:$true] %s83_s25 }
  0x11   :  { %s71_s27 = sshll.u32 %s1320_s26, 4  ;;  %s1321_s2 = smov [#allocation11]   ;;  %s72_s27 = int_to_ptr.vmem [resolvable:$true] %s71_s27 }
  0x12   :  { %77 = dma.hbm_to_vmem [thread:$0]  %s70_s23, 25600, %s72_s27, [#allocation9], %s1316_s11, %s1316_s11, %s1317_s12  }
  0x13   :  { %s85_s28 = sshll.u32 %s1321_s2, 4  ;;  %s86_s28 = int_to_ptr.vmem [resolvable:$true] %s85_s28 }
  0x14   :  { %88 = dma.hbm_to_vmem [thread:$0]  %s84_s25, 128, %s86_s28, [#allocation12]  }
  0x15   :  { %1302 = dma.done.wait [#allocation3], 32  }
  0x16   :  { %1303 = vsyncadd [#allocation3], 4294967264 }
  0x17   :  { %1304 = dma.done.wait [#allocation6], 128  }
  0x18   :  { %1305 = vsyncadd [#allocation6], 4294967168 }
  0x19   :  { %1306 = dma.done.wait [#allocation9], 38912  }
  0x1a   :  { %1307 = vsyncadd [#allocation9], 4294928384 }
  0x1b   :  { %1308 = dma.done.wait [#allocation12], 128  }
  0x1c   :  { %1309 = vsyncadd [#allocation12], 4294967168  ;;  %v339_v0 = vld [vmem:[#allocation10 + $0x3c0] sm:$0xff]  ;;  %v340_v2 = vld [vmem:[#allocation10 + $0x3c8] sm:$0xff]  ;;  %vm424_vm0 = vcmask 588800   ;;  %vm751_vm1 = vcmask 1043456  }
  0x1d   :  { %v411_v1 = vld [vmem:[#allocation10 + $0x600] sm:$0xff]  ;;  %427 = vmatpush.msra.mxu0 %v339_v0  ;;  %v413_v3 = vld [vmem:[#allocation10 + $0x610] sm:$0xff]  ;;  %467 = vmatpush.msra.mxu2 %v340_v2  ;;  %v332_v6 = vld [vmem:[#allocation10 + $0x388] sm:$0xff]  ;;  %vm747_vm2 = vcmask 818176   ;;  %vm1004_vm3 = vcmask 1041408   ;;  %vm1007_vm4 = vcmask 584706  }
  0x1e   :  { %454 = vmatpush.msra.mxu1 %v411_v1  ;;  %v331_v4 = vld [vmem:[#allocation10 + $0x380] sm:$0xff]  ;;  %534 = vmatpush.msra.mxu3 %v413_v3  ;;  %v405_v7 = vld [vmem:[#allocation10 + $0x5d0] sm:$0xff]  ;;  %v324_v10 = vld [vmem:[#allocation10 + $0x348] sm:$0xff]  ;;  %s1322_s4 = smov [#allocation14]   ;;  %s1038_s8 = sshll.u32 %s1460_s7, 4  ;;  %s1039_s8 = int_to_ptr.hbm [resolvable:$true] %s1038_s8 }
  0x1f   :  { %v403_v5 = vld [vmem:[#allocation10 + $0x5c0] sm:$0xff]  ;;  %428 = vmatpush.msra.mxu0 %v331_v4  ;;  %v397_v11 = vld [vmem:[#allocation10 + $0x590] sm:$0xff]  ;;  %468 = vmatpush.msra.mxu2 %v332_v6  ;;  %v316_v14 = vld [vmem:[#allocation10 + $0x308] sm:$0xff]  ;;  %s1036_s5 = sshll.u32 %s1322_s4, 4  ;;  %s1323_s7 = smov [#allocation13]   ;;  %s1037_s5 = int_to_ptr.vmem [resolvable:$true] %s1036_s5 }
  0x20   :  { %v323_v8 = vld [vmem:[#allocation10 + $0x340] sm:$0xff]  ;;  %455 = vmatpush.msra.mxu1 %v403_v5  ;;  %535 = vmatpush.msra.mxu3 %v405_v7  ;;  %v389_v15 = vld [vmem:[#allocation10 + $0x550] sm:$0xff]  ;;  %v308_v18 = vld [vmem:[#allocation10 + $0x2c8] sm:$0xff]  ;;  %s1025_s9 = sshll.u32 %s1323_s7, 4  ;;  %s1027_s12 = sshll.u32 %s1459_s6, 4  ;;  %s1026_s9 = int_to_ptr.vmem [resolvable:$true] %s1025_s9  ;;  %s1028_s12 = int_to_ptr.hbm [resolvable:$true] %s1027_s12 }
  0x21   :  { %v395_v9 = vld [vmem:[#allocation10 + $0x580] sm:$0xff]  ;;  %429 = vmatpush.msra.mxu0 %v323_v8  ;;  %469 = vmatpush.msra.mxu2 %v324_v10  ;;  %v381_v19 = vld [vmem:[#allocation10 + $0x510] sm:$0xff]  ;;  %v300_v22 = vld [vmem:[#allocation10 + $0x288] sm:$0xff] }
  0x22   :  { %v315_v12 = vld [vmem:[#allocation10 + $0x300] sm:$0xff]  ;;  %456 = vmatpush.msra.mxu1 %v395_v9  ;;  %536 = vmatpush.msra.mxu3 %v397_v11  ;;  %v373_v23 = vld [vmem:[#allocation10 + $0x4d0] sm:$0xff]  ;;  %v292_v26 = vld [vmem:[#allocation10 + $0x248] sm:$0xff] }
  0x23   :  { %v387_v13 = vld [vmem:[#allocation10 + $0x540] sm:$0xff]  ;;  %430 = vmatpush.msra.mxu0 %v315_v12  ;;  %470 = vmatpush.msra.mxu2 %v316_v14  ;;  %v365_v27 = vld [vmem:[#allocation10 + $0x490] sm:$0xff]  ;;  %v284_v30 = vld [vmem:[#allocation10 + $0x208] sm:$0xff] }
  0x24   :  { %v307_v16 = vld [vmem:[#allocation10 + $0x2c0] sm:$0xff]  ;;  %457 = vmatpush.msra.mxu1 %v387_v13  ;;  %537 = vmatpush.msra.mxu3 %v389_v15  ;;  %v357_v31 = vld [vmem:[#allocation10 + $0x450] sm:$0xff]  ;;  %v276_v34 = vld [vmem:[#allocation10 + $0x1c8] sm:$0xff] }
  0x25   :  { %v379_v17 = vld [vmem:[#allocation10 + $0x500] sm:$0xff]  ;;  %431 = vmatpush.msra.mxu0 %v307_v16  ;;  %471 = vmatpush.msra.mxu2 %v308_v18  ;;  %v349_v35 = vld [vmem:[#allocation10 + $0x410] sm:$0xff]  ;;  %v268_v39 = vld [vmem:[#allocation10 + $0x188] sm:$0xff] }
  0x26   :  { %v299_v20 = vld [vmem:[#allocation10 + $0x280] sm:$0xff]  ;;  %458 = vmatpush.msra.mxu1 %v379_v17  ;;  %538 = vmatpush.msra.mxu3 %v381_v19  ;;  %v341_v36 = vld [vmem:[#allocation10 + $0x3d0] sm:$0xff]  ;;  %v260_v43 = vld [vmem:[#allocation10 + $0x148] sm:$0xff] }
  0x27   :  { %v371_v21 = vld [vmem:[#allocation10 + $0x4c0] sm:$0xff]  ;;  %432 = vmatpush.msra.mxu0 %v299_v20  ;;  %472 = vmatpush.msra.mxu2 %v300_v22  ;;  %v333_v40 = vld [vmem:[#allocation10 + $0x390] sm:$0xff]  ;;  %v252_v47 = vld [vmem:[#allocation10 + $0x108] sm:$0xff] }
  0x28   :  { %v291_v24 = vld [vmem:[#allocation10 + $0x240] sm:$0xff]  ;;  %459 = vmatpush.msra.mxu1 %v371_v21  ;;  %539 = vmatpush.msra.mxu3 %v373_v23  ;;  %v325_v44 = vld [vmem:[#allocation10 + $0x350] sm:$0xff]  ;;  %v244_v51 = vld [vmem:[#allocation10 + $0xc8] sm:$0xff] }
  0x29   :  { %v363_v25 = vld [vmem:[#allocation10 + $0x480] sm:$0xff]  ;;  %433 = vmatpush.msra.mxu0 %v291_v24  ;;  %473 = vmatpush.msra.mxu2 %v292_v26  ;;  %v317_v48 = vld [vmem:[#allocation10 + $0x310] sm:$0xff]  ;;  %v236_v55 = vld [vmem:[#allocation10 + $0x88] sm:$0xff] }
  0x2a   :  { %v283_v28 = vld [vmem:[#allocation10 + $0x200] sm:$0xff]  ;;  %460 = vmatpush.msra.mxu1 %v363_v25  ;;  %540 = vmatpush.msra.mxu3 %v365_v27  ;;  %v309_v52 = vld [vmem:[#allocation10 + $0x2d0] sm:$0xff]  ;;  %v228_v59 = vld [vmem:[#allocation10 + $0x48] sm:$0xff] }
  0x2b   :  { %v355_v29 = vld [vmem:[#allocation10 + $0x440] sm:$0xff]  ;;  %434 = vmatpush.msra.mxu0 %v283_v28  ;;  %474 = vmatpush.msra.mxu2 %v284_v30  ;;  %v301_v56 = vld [vmem:[#allocation10 + $0x290] sm:$0xff]  ;;  %v220_v63 = vld [vmem:[#allocation10 + $0x8] sm:$0xff] }
  0x2c   :  { %v275_v32 = vld [vmem:[#allocation10 + $0x1c0] sm:$0xff]  ;;  %461 = vmatpush.msra.mxu1 %v355_v29  ;;  %541 = vmatpush.msra.mxu3 %v357_v31  ;;  %v293_v60 = vld [vmem:[#allocation10 + $0x250] sm:$0xff]  ;;  %v412_v0 = vld [vmem:[#allocation10 + $0x608] sm:$0xff] }
  0x2d   :  { %v347_v33 = vld [vmem:[#allocation10 + $0x400] sm:$0xff]  ;;  %435 = vmatpush.msra.mxu0 %v275_v32  ;;  %475 = vmatpush.msra.mxu2 %v276_v34  ;;  %v285_v1 = vld [vmem:[#allocation10 + $0x210] sm:$0xff]  ;;  %v414_v2 = vld [vmem:[#allocation10 + $0x618] sm:$0xff] }
  0x2e   :  { %v343_v37 = vld [vmem:[#allocation10 + $0x3e0] sm:$0xff]  ;;  %462 = vmatpush.msra.mxu1 %v347_v33  ;;  %542 = vmatpush.msra.mxu3 %v349_v35  ;;  %v404_v4 = vld [vmem:[#allocation10 + $0x5c8] sm:$0xff]  ;;  %v277_v5 = vld [vmem:[#allocation10 + $0x1d0] sm:$0xff] }
  0x2f   :  { %v267_v38 = vld [vmem:[#allocation10 + $0x180] sm:$0xff]  ;;  %476 = vmatpush.msra.mxu2 %v268_v39  ;;  %v406_v6 = vld [vmem:[#allocation10 + $0x5d8] sm:$0xff]  ;;  %v396_v9 = vld [vmem:[#allocation10 + $0x588] sm:$0xff] }
  0x30   :  { %v335_v41 = vld [vmem:[#allocation10 + $0x3a0] sm:$0xff]  ;;  %507 = vmatpush.msrb.mxu1 %v341_v36  ;;  %587 = vmatpush.msrb.mxu3 %v343_v37  ;;  %v218_v8 = vld [vmem:[#allocation5] sm:$0xf]  ;;  %v269_v10 = vld [vmem:[#allocation10 + $0x190] sm:$0xff] }
  0x31   :  { %v259_v42 = vld [vmem:[#allocation10 + $0x140] sm:$0xff]  ;;  %436 = vmatpush.msra.mxu0 %v267_v38  ;;  %477 = vmatpush.msra.mxu2 %v260_v43  ;;  %420 = vst [vmem:[#allocation1] ss:$4 sm:$0xff] %v218_v8  ;;  %v398_v11 = vld [vmem:[#allocation10 + $0x598] sm:$0xff]  ;;  %v388_v13 = vld [vmem:[#allocation10 + $0x548] sm:$0xff] }
  0x32   :  { %v327_v45 = vld [vmem:[#allocation10 + $0x360] sm:$0xff]  ;;  %508 = vmatpush.msrb.mxu1 %v333_v40  ;;  %588 = vmatpush.msrb.mxu3 %v335_v41  ;;  %v261_v14 = vld [vmem:[#allocation10 + $0x150] sm:$0xff]  ;;  %v390_v15 = vld [vmem:[#allocation10 + $0x558] sm:$0xff] }
  0x33   :  { %v251_v46 = vld [vmem:[#allocation10 + $0x100] sm:$0xff]  ;;  %437 = vmatpush.msra.mxu0 %v259_v42  ;;  %478 = vmatpush.msra.mxu2 %v252_v47  ;;  %v380_v17 = vld [vmem:[#allocation10 + $0x508] sm:$0xff]  ;;  %v253_v18 = vld [vmem:[#allocation10 + $0x110] sm:$0xff] }
  0x34   :  { %v319_v49 = vld [vmem:[#allocation10 + $0x320] sm:$0xff]  ;;  %509 = vmatpush.msrb.mxu1 %v325_v44  ;;  %589 = vmatpush.msrb.mxu3 %v327_v45  ;;  %v382_v19 = vld [vmem:[#allocation10 + $0x518] sm:$0xff]  ;;  %v372_v21 = vld [vmem:[#allocation10 + $0x4c8] sm:$0xff] }
  0x35   :  { %v243_v50 = vld [vmem:[#allocation10 + $0xc0] sm:$0xff]  ;;  %438 = vmatpush.msra.mxu0 %v251_v46  ;;  %479 = vmatpush.msra.mxu2 %v244_v51  ;;  %v988_v22 = vld [vmem:[#allocation7] sm:$0xf]  ;;  %v245_v23 = vld [vmem:[#allocation10 + $0xd0] sm:$0xff] }
  0x36   :  { %v311_v53 = vld [vmem:[#allocation10 + $0x2e0] sm:$0xff]  ;;  %510 = vmatpush.msrb.mxu1 %v317_v48  ;;  %590 = vmatpush.msrb.mxu3 %v319_v49  ;;  %v374_v24 = vld [vmem:[#allocation10 + $0x4d8] sm:$0xff]  ;;  %v364_v28 = vld [vmem:[#allocation10 + $0x488] sm:$0xff] }
  0x37   :  { %v235_v54 = vld [vmem:[#allocation10 + $0x80] sm:$0xff]  ;;  %439 = vmatpush.msra.mxu0 %v243_v50  ;;  %480 = vmatpush.msra.mxu2 %v236_v55  ;;  %v237_v29 = vld [vmem:[#allocation10 + $0x90] sm:$0xff]  ;;  %v366_v30 = vld [vmem:[#allocation10 + $0x498] sm:$0xff] }
  0x38   :  { %v303_v57 = vld [vmem:[#allocation10 + $0x2a0] sm:$0xff]  ;;  %511 = vmatpush.msrb.mxu1 %v309_v52  ;;  %591 = vmatpush.msrb.mxu3 %v311_v53  ;;  %v1382_v26 = vld.sshfl [vmem:[#allocation1] sm:$0xff pattern:$0x73625140]  ;;  %v358_v34 = vld [vmem:[#allocation10 + $0x458] sm:$0xff] }
  0x39   :  { %v227_v58 = vld [vmem:[#allocation10 + $0x40] sm:$0xff]  ;;  %440 = vmatpush.msra.mxu0 %v235_v54  ;;  %481 = vmatpush.msra.mxu2 %v228_v59  ;;  %v1384_v27 = vld.sshfl [vmem:[#allocation1 + $0x8] sm:$0xff pattern:$0x73625140]  ;;  %v356_v32 = vld [vmem:[#allocation10 + $0x448] sm:$0xff] }
  0x3a   :  { %v295_v61 = vld [vmem:[#allocation10 + $0x260] sm:$0xff]  ;;  %512 = vmatpush.msrb.mxu1 %v301_v56  ;;  %592 = vmatpush.msrb.mxu3 %v303_v57  ;;  %990 = vst [vmem:[#allocation1] ss:$4 sm:$0xff] %v988_v22  ;;  %v229_v33 = vld [vmem:[#allocation10 + $0x50] sm:$0xff]  ;;  %v348_v36 = vld [vmem:[#allocation10 + $0x408] sm:$0xff] }
  0x3b   :  { %v219_v62 = vld [vmem:[#allocation10] sm:$0xff]  ;;  %441 = vmatpush.msra.mxu0 %v227_v58  ;;  %482 = vmatpush.msra.mxu2 %v220_v63  ;;  %v221_v37 = vld [vmem:[#allocation10 + $0x10] sm:$0xff]  ;;  %v350_v38 = vld [vmem:[#allocation10 + $0x418] sm:$0xff] }
  0x3c   :  { %513 = vmatpush.msrb.mxu1 %v293_v60  ;;  %593 = vmatpush.msrb.mxu3 %v295_v61  ;;  %v287_v3 = vld [vmem:[#allocation10 + $0x220] sm:$0xff]  ;;  %v342_v40 = vld [vmem:[#allocation10 + $0x3d8] sm:$0xff]  ;;  %v344_v42 = vld [vmem:[#allocation10 + $0x3e8] sm:$0xff] }
  0x3d   :  { %442 = vmatpush.msra.mxu0 %v219_v62  ;;  %v279_v7 = vld [vmem:[#allocation10 + $0x1e0] sm:$0xff]  ;;  %574 = vmatpush.msrb.mxu2 %v414_v2  ;;  %v417_v43 = vld [vmem:[#allocation10 + $0x630] sm:$0xff]  ;;  %v334_v44 = vld [vmem:[#allocation10 + $0x398] sm:$0xff] }
  0x3e   :  { %514 = vmatpush.msrb.mxu1 %v285_v1  ;;  %594 = vmatpush.msrb.mxu3 %v287_v3  ;;  %v271_v12 = vld [vmem:[#allocation10 + $0x1a0] sm:$0xff]  ;;  %v336_v46 = vld [vmem:[#allocation10 + $0x3a8] sm:$0xff]  ;;  %v409_v47 = vld [vmem:[#allocation10 + $0x5f0] sm:$0xff] }
  0x3f   :  { %494 = vmatpush.msrb.mxu0 %v412_v0  ;;  %575 = vmatpush.msrb.mxu2 %v406_v6  ;;  %v263_v16 = vld [vmem:[#allocation10 + $0x160] sm:$0xff]  ;;  %v326_v48 = vld [vmem:[#allocation10 + $0x358] sm:$0xff]  ;;  %v328_v50 = vld [vmem:[#allocation10 + $0x368] sm:$0xff] }
  0x40   :  { %515 = vmatpush.msrb.mxu1 %v277_v5  ;;  %595 = vmatpush.msrb.mxu3 %v279_v7  ;;  %v255_v20 = vld [vmem:[#allocation10 + $0x120] sm:$0xff]  ;;  %v401_v51 = vld [vmem:[#allocation10 + $0x5b0] sm:$0xff]  ;;  %v318_v52 = vld [vmem:[#allocation10 + $0x318] sm:$0xff] }
  0x41   :  { %495 = vmatpush.msrb.mxu0 %v404_v4  ;;  %576 = vmatpush.msrb.mxu2 %v398_v11  ;;  %v247_v25 = vld [vmem:[#allocation10 + $0xe0] sm:$0xff]  ;;  %v320_v54 = vld [vmem:[#allocation10 + $0x328] sm:$0xff]  ;;  %v393_v55 = vld [vmem:[#allocation10 + $0x570] sm:$0xff] }
  0x42   :  { %516 = vmatpush.msrb.mxu1 %v269_v10  ;;  %596 = vmatpush.msrb.mxu3 %v271_v12  ;;  %v239_v31 = vld [vmem:[#allocation10 + $0xa0] sm:$0xff]  ;;  %v310_v56 = vld [vmem:[#allocation10 + $0x2d8] sm:$0xff]  ;;  %v312_v58 = vld [vmem:[#allocation10 + $0x2e8] sm:$0xff] }
  0x43   :  { %496 = vmatpush.msrb.mxu0 %v396_v9  ;;  %577 = vmatpush.msrb.mxu2 %v390_v15  ;;  %v231_v35 = vld [vmem:[#allocation10 + $0x60] sm:$0xff]  ;;  %v385_v59 = vld [vmem:[#allocation10 + $0x530] sm:$0xff]  ;;  %v302_v60 = vld [vmem:[#allocation10 + $0x298] sm:$0xff] }
  0x44   :  { %517 = vmatpush.msrb.mxu1 %v261_v14  ;;  %597 = vmatpush.msrb.mxu3 %v263_v16  ;;  %v223_v39 = vld [vmem:[#allocation10 + $0x20] sm:$0xff]  ;;  %v304_v62 = vld [vmem:[#allocation10 + $0x2a8] sm:$0xff]  ;;  %v377_v63 = vld [vmem:[#allocation10 + $0x4f0] sm:$0xff] }
  0x45   :  { %497 = vmatpush.msrb.mxu0 %v388_v13  ;;  %578 = vmatpush.msrb.mxu2 %v382_v19  ;;  %v415_v41 = vld [vmem:[#allocation10 + $0x620] sm:$0xff]  ;;  %v294_v1 = vld [vmem:[#allocation10 + $0x258] sm:$0xff]  ;;  %v296_v2 = vld [vmem:[#allocation10 + $0x268] sm:$0xff] }
  0x46   :  { %518 = vmatpush.msrb.mxu1 %v253_v18  ;;  %598 = vmatpush.msrb.mxu3 %v255_v20  ;;  %v407_v45 = vld [vmem:[#allocation10 + $0x5e0] sm:$0xff]  ;;  %v369_v3 = vld [vmem:[#allocation10 + $0x4b0] sm:$0xff]  ;;  %v286_v5 = vld [vmem:[#allocation10 + $0x218] sm:$0xff] }
  0x47   :  { %498 = vmatpush.msrb.mxu0 %v380_v17  ;;  %579 = vmatpush.msrb.mxu2 %v374_v24  ;;  %v399_v49 = vld [vmem:[#allocation10 + $0x5a0] sm:$0xff]  ;;  %v288_v6 = vld [vmem:[#allocation10 + $0x228] sm:$0xff]  ;;  %v361_v7 = vld [vmem:[#allocation10 + $0x470] sm:$0xff] }
  0x48   :  { %519 = vmatpush.msrb.mxu1 %v245_v23  ;;  %599 = vmatpush.msrb.mxu3 %v247_v25  ;;  %v391_v53 = vld [vmem:[#allocation10 + $0x560] sm:$0xff]  ;;  %v278_v8 = vld [vmem:[#allocation10 + $0x1d8] sm:$0xff]  ;;  %v280_v10 = vld [vmem:[#allocation10 + $0x1e8] sm:$0xff] }
  0x49   :  { %499 = vmatpush.msrb.mxu0 %v372_v21  ;;  %580 = vmatpush.msrb.mxu2 %v366_v30  ;;  %v383_v57 = vld [vmem:[#allocation10 + $0x520] sm:$0xff]  ;;  %v353_v11 = vld [vmem:[#allocation10 + $0x430] sm:$0xff]  ;;  %v270_v14 = vld [vmem:[#allocation10 + $0x198] sm:$0xff] }
  0x4a   :  { %520 = vmatpush.msrb.mxu1 %v237_v29  ;;  %600 = vmatpush.msrb.mxu3 %v239_v31  ;;  %v375_v61 = vld [vmem:[#allocation10 + $0x4e0] sm:$0xff]  ;;  %v345_v12 = vld [vmem:[#allocation10 + $0x3f0] sm:$0xff]  ;;  %v272_v15 = vld [vmem:[#allocation10 + $0x1a8] sm:$0xff] }
  0x4b   :  { %500 = vmatpush.msrb.mxu0 %v364_v28  ;;  %581 = vmatpush.msrb.mxu2 %v358_v34  ;;  %v367_v0 = vld [vmem:[#allocation10 + $0x4a0] sm:$0xff]  ;;  %v337_v16 = vld [vmem:[#allocation10 + $0x3b0] sm:$0xff]  ;;  %v262_v18 = vld [vmem:[#allocation10 + $0x158] sm:$0xff] }
  0x4c   :  { %521 = vmatpush.msrb.mxu1 %v229_v33  ;;  %601 = vmatpush.msrb.mxu3 %v231_v35  ;;  %v359_v4 = vld [vmem:[#allocation10 + $0x460] sm:$0xff]  ;;  %v264_v19 = vld [vmem:[#allocation10 + $0x168] sm:$0xff]  ;;  %v329_v20 = vld [vmem:[#allocation10 + $0x370] sm:$0xff] }
  0x4d   :  { %501 = vmatpush.msrb.mxu0 %v356_v32  ;;  %582 = vmatpush.msrb.mxu2 %v350_v38  ;;  %v351_v9 = vld [vmem:[#allocation10 + $0x420] sm:$0xff]  ;;  %v254_v22 = vld [vmem:[#allocation10 + $0x118] sm:$0xff]  ;;  %v256_v23 = vld [vmem:[#allocation10 + $0x128] sm:$0xff] }
  0x4e   :  { %522 = vmatpush.msrb.mxu1 %v221_v37  ;;  %602 = vmatpush.msrb.mxu3 %v223_v39  ;;  %v210_v13 = vld [vmem:[#allocation8 + $0x300] sm:$0xf]  ;;  %v321_v24 = vld [vmem:[#allocation10 + $0x330] sm:$0xff]  ;;  %v246_v28 = vld [vmem:[#allocation10 + $0xd8] sm:$0xff] }
  0x4f   :  { %502 = vmatpush.msrb.mxu0 %v348_v36  ;;  %1056 = vmatmul.msk.f32.vlgmr.msra.gmra.mxu1 %vm424_vm0, %v1384_v27  ;;  %v202_v17 = vld [vmem:[#allocation8 + $0x2c0] sm:$0xff]  ;;  %v248_v29 = vld [vmem:[#allocation10 + $0xe8] sm:$0xff]  ;;  %v313_v30 = vld [vmem:[#allocation10 + $0x2f0] sm:$0xff] }
  0x50   :  { %443 = vmatmul.f32.vlgmr.msra.gmra.mxu0 %v1382_v26  ;;  %483 = vmatmul.f32.vlgmr.msra.gmra.mxu2 %v1382_v26  ;;  %v194_v21 = vld [vmem:[#allocation8 + $0x280] sm:$0xff]  ;;  %v238_v32 = vld [vmem:[#allocation10 + $0x98] sm:$0xff]  ;;  %v240_v33 = vld [vmem:[#allocation10 + $0xa8] sm:$0xff] }
  0x51   :  { %1058 = vmatmul.msk.f32.vlgmr.msra.gmra.mxu3 %vm424_vm0, %v1384_v27  ;;  %547 = vmatpush.msra.mxu0 %v342_v40  ;;  %v186_v25 = vld [vmem:[#allocation8 + $0x240] sm:$0xff]  ;;  %v305_v34 = vld [vmem:[#allocation10 + $0x2b0] sm:$0xff]  ;;  %v230_v36 = vld [vmem:[#allocation10 + $0x58] sm:$0xff] }
  0x52   :  { %614 = vmatpush.msra.mxu1 %v415_v41  ;;  %627 = vmatpush.msra.mxu2 %v344_v42  ;;  %v178_v31 = vld [vmem:[#allocation8 + $0x200] sm:$0xff]  ;;  %v232_v37 = vld [vmem:[#allocation10 + $0x68] sm:$0xff]  ;;  %v297_v38 = vld [vmem:[#allocation10 + $0x270] sm:$0xff] }
  0x53   :  { %694 = vmatpush.msra.mxu3 %v417_v43  ;;  %548 = vmatpush.msra.mxu0 %v334_v44  ;;  %v170_v35 = vld [vmem:[#allocation8 + $0x1c0] sm:$0xff]  ;;  %v222_v40 = vld [vmem:[#allocation10 + $0x18] sm:$0xff]  ;;  %v224_v41 = vld [vmem:[#allocation10 + $0x28] sm:$0xff] }
  0x54   :  { %615 = vmatpush.msra.mxu1 %v407_v45  ;;  %628 = vmatpush.msra.mxu2 %v336_v46  ;;  %v162_v39 = vld [vmem:[#allocation8 + $0x180] sm:$0xff]  ;;  %v416_v42 = vld [vmem:[#allocation10 + $0x628] sm:$0xff]  ;;  %v289_v43 = vld [vmem:[#allocation10 + $0x230] sm:$0xff] }
  0x55   :  { %695 = vmatpush.msra.mxu3 %v409_v47  ;;  %549 = vmatpush.msra.mxu0 %v326_v48  ;;  %v418_v44 = vld [vmem:[#allocation10 + $0x638] sm:$0xff]  ;;  %v154_v45 = vld [vmem:[#allocation8 + $0x140] sm:$0xff]  ;;  %v408_v46 = vld [vmem:[#allocation10 + $0x5e8] sm:$0xff] }
  0x56   :  { %616 = vmatpush.msra.mxu1 %v399_v49  ;;  %629 = vmatpush.msra.mxu2 %v328_v50  ;;  %v281_v47 = vld [vmem:[#allocation10 + $0x1f0] sm:$0xff]  ;;  %v410_v48 = vld [vmem:[#allocation10 + $0x5f8] sm:$0xff]  ;;  %v146_v49 = vld [vmem:[#allocation8 + $0x100] sm:$0xff] }
  0x57   :  { %696 = vmatpush.msra.mxu3 %v401_v51  ;;  %550 = vmatpush.msra.mxu0 %v318_v52  ;;  %v400_v50 = vld [vmem:[#allocation10 + $0x5a8] sm:$0xff]  ;;  %v273_v51 = vld [vmem:[#allocation10 + $0x1b0] sm:$0xff]  ;;  %v402_v52 = vld [vmem:[#allocation10 + $0x5b8] sm:$0xff] }
  0x58   :  { %617 = vmatpush.msra.mxu1 %v391_v53  ;;  %630 = vmatpush.msra.mxu2 %v320_v54  ;;  %v138_v53 = vld [vmem:[#allocation8 + $0xc0] sm:$0xff]  ;;  %v392_v54 = vld [vmem:[#allocation10 + $0x568] sm:$0xff]  ;;  %vm1440_vm5 = vmor %vm1007_vm4, %vm1004_vm3 }
  0x59   :  { %697 = vmatpush.msra.mxu3 %v393_v55  ;;  %551 = vmatpush.msra.mxu0 %v310_v56  ;;  %v265_v55 = vld [vmem:[#allocation10 + $0x170] sm:$0xff]  ;;  %v394_v56 = vld [vmem:[#allocation10 + $0x578] sm:$0xff] }
  0x5a   :  { %618 = vmatpush.msra.mxu1 %v383_v57  ;;  %631 = vmatpush.msra.mxu2 %v312_v58  ;;  %v130_v57 = vld [vmem:[#allocation8 + $0x80] sm:$0xff]  ;;  %v384_v58 = vld [vmem:[#allocation10 + $0x528] sm:$0xff] }
  0x5b   :  { %698 = vmatpush.msra.mxu3 %v385_v59  ;;  %552 = vmatpush.msra.mxu0 %v302_v60  ;;  %v257_v59 = vld [vmem:[#allocation10 + $0x130] sm:$0xff]  ;;  %v386_v60 = vld [vmem:[#allocation10 + $0x538] sm:$0xff] }
  0x5c   :  { %619 = vmatpush.msra.mxu1 %v375_v61  ;;  %632 = vmatpush.msra.mxu2 %v304_v62  ;;  %v122_v61 = vld [vmem:[#allocation8 + $0x40] sm:$0xff]  ;;  %v376_v62 = vld [vmem:[#allocation10 + $0x4e8] sm:$0xff] }
  0x5d   :  { %699 = vmatpush.msra.mxu3 %v377_v63  ;;  %1057 = vmatmul.msk.f32.vlgmr.msrb.gmra.mxu0 %vm424_vm0, %v1384_v27  ;;  %v249_v63 = vld [vmem:[#allocation10 + $0xf0] sm:$0xff] }
  0x5e   :  { %620 = vmatpush.msra.mxu1 %v367_v0  ;;  %553 = vmatpush.msra.mxu0 %v294_v1  ;;  %v378_v0 = vld [vmem:[#allocation10 + $0x4f8] sm:$0xff]  ;;  %v114_v1 = vld [vmem:[#allocation8] sm:$0xff] }
  0x5f   :  { %633 = vmatpush.msra.mxu2 %v296_v2  ;;  %700 = vmatpush.msra.mxu3 %v369_v3  ;;  %v1403_v2 = vld [vmem:[#allocation2] sm:$0x3]  ;;  %v213_v3 = vld [vmem:[#allocation8 + $0x318] sm:$0xf] }
  0x60   :  { %621 = vmatpush.msra.mxu1 %v359_v4  ;;  %554 = vmatpush.msra.mxu0 %v286_v5  ;;  %v368_v4 = vld [vmem:[#allocation10 + $0x4a8] sm:$0xff]  ;;  %v241_v5 = vld [vmem:[#allocation10 + $0xb0] sm:$0xff] }
  0x61   :  { %634 = vmatpush.msra.mxu2 %v288_v6  ;;  %701 = vmatpush.msra.mxu3 %v361_v7  ;;  %v370_v6 = vld [vmem:[#allocation10 + $0x4b8] sm:$0xff] }
  0x62   :  { %523 = vmatmul.f32.vlgmr.msrb.gmra.mxu1 %v1382_v26  ;;  %555 = vmatpush.msra.mxu0 %v278_v8  ;;  %v205_v7 = vld [vmem:[#allocation8 + $0x2d8] sm:$0xff]  ;;  %v360_v8 = vld [vmem:[#allocation10 + $0x468] sm:$0xff] }
  0x63   :  { %622 = vmatpush.msra.mxu1 %v351_v9  ;;  %635 = vmatpush.msra.mxu2 %v280_v10  ;;  %v233_v9 = vld [vmem:[#allocation10 + $0x70] sm:$0xff]  ;;  %v362_v10 = vld [vmem:[#allocation10 + $0x478] sm:$0xff] }
  0x64   :  { %702 = vmatpush.msra.mxu3 %v353_v11  ;;  %556 = vmatpush.msra.mxu0 %v270_v14  ;;  %v197_v11 = vld [vmem:[#allocation8 + $0x298] sm:$0xff] }
  0x65   :  { %603 = vmatmul.f32.vlgmr.msrb.gmra.mxu3 %v1382_v26  ;;  %667 = vmatpush.msrb.mxu1 %v345_v12  ;;  %v352_v12 = vld [vmem:[#allocation10 + $0x428] sm:$0xff]  ;;  %v354_v14 = vld [vmem:[#allocation10 + $0x438] sm:$0xff] }
  0x66   :  { %1064 = vmatpush.msk.msrb.mxu3 %vm751_vm1, %v210_v13  ;;  %636 = vmatpush.msra.mxu2 %v272_v15  ;;  %v225_v13 = vld [vmem:[#allocation10 + $0x30] sm:$0xff]  ;;  %v346_v15 = vld [vmem:[#allocation10 + $0x3f8] sm:$0xff] }
  0x67   :  { %668 = vmatpush.msrb.mxu1 %v337_v16  ;;  %557 = vmatpush.msra.mxu0 %v262_v18  ;;  %v211_v16 = vld [vmem:[#allocation8 + $0x308] sm:$0xf]  ;;  %v189_v18 = vld [vmem:[#allocation8 + $0x258] sm:$0xff] }
  0x68   :  { %780 = vmatpush.msrb.mxu3 %v202_v17  ;;  %637 = vmatpush.msra.mxu2 %v264_v19  ;;  %v212_v17 = vld [vmem:[#allocation8 + $0x310] sm:$0xf]  ;;  %v338_v19 = vld [vmem:[#allocation10 + $0x3b8] sm:$0xff] }
  0x69   :  { %669 = vmatpush.msrb.mxu1 %v329_v20  ;;  %558 = vmatpush.msra.mxu0 %v254_v22  ;;  %v203_v20 = vld [vmem:[#allocation8 + $0x2c8] sm:$0xff]  ;;  %v181_v22 = vld [vmem:[#allocation8 + $0x218] sm:$0xff] }
  0x6a   :  { %781 = vmatpush.msrb.mxu3 %v194_v21  ;;  %638 = vmatpush.msra.mxu2 %v256_v23  ;;  %v204_v21 = vld [vmem:[#allocation8 + $0x2d0] sm:$0xff]  ;;  %v330_v23 = vld [vmem:[#allocation10 + $0x378] sm:$0xff] }
  0x6b   :  { %670 = vmatpush.msrb.mxu1 %v321_v24  ;;  %559 = vmatpush.msra.mxu0 %v246_v28  ;;  %v195_v24 = vld [vmem:[#allocation8 + $0x288] sm:$0xff]  ;;  %v173_v28 = vld [vmem:[#allocation8 + $0x1d8] sm:$0xff] }
  0x6c   :  { %782 = vmatpush.msrb.mxu3 %v186_v25  ;;  %639 = vmatpush.msra.mxu2 %v248_v29  ;;  %v196_v25 = vld [vmem:[#allocation8 + $0x290] sm:$0xff]  ;;  %v322_v29 = vld [vmem:[#allocation10 + $0x338] sm:$0xff] }
  0x6d   :  { %671 = vmatpush.msrb.mxu1 %v313_v30  ;;  %560 = vmatpush.msra.mxu0 %v238_v32  ;;  %v187_v30 = vld [vmem:[#allocation8 + $0x248] sm:$0xff]  ;;  %v165_v32 = vld [vmem:[#allocation8 + $0x198] sm:$0xff] }
  0x6e   :  { %783 = vmatpush.msrb.mxu3 %v178_v31  ;;  %640 = vmatpush.msra.mxu2 %v240_v33  ;;  %v188_v31 = vld [vmem:[#allocation8 + $0x250] sm:$0xff]  ;;  %v314_v33 = vld [vmem:[#allocation10 + $0x2f8] sm:$0xff] }
  0x6f   :  { %672 = vmatpush.msrb.mxu1 %v305_v34  ;;  %561 = vmatpush.msra.mxu0 %v230_v36  ;;  %v179_v34 = vld [vmem:[#allocation8 + $0x208] sm:$0xff]  ;;  %v157_v36 = vld [vmem:[#allocation8 + $0x158] sm:$0xff] }
  0x70   :  { %784 = vmatpush.msrb.mxu3 %v170_v35  ;;  %641 = vmatpush.msra.mxu2 %v232_v37  ;;  %v180_v35 = vld [vmem:[#allocation8 + $0x210] sm:$0xff]  ;;  %v306_v37 = vld [vmem:[#allocation10 + $0x2b8] sm:$0xff] }
  0x71   :  { %673 = vmatpush.msrb.mxu1 %v297_v38  ;;  %562 = vmatpush.msra.mxu0 %v222_v40  ;;  %v171_v38 = vld [vmem:[#allocation8 + $0x1c8] sm:$0xff]  ;;  %v149_v40 = vld [vmem:[#allocation8 + $0x118] sm:$0xff] }
  0x72   :  { %785 = vmatpush.msrb.mxu3 %v162_v39  ;;  %642 = vmatpush.msra.mxu2 %v224_v41  ;;  %v172_v39 = vld [vmem:[#allocation8 + $0x1d0] sm:$0xff]  ;;  %v163_v41 = vld [vmem:[#allocation8 + $0x188] sm:$0xff] }
  0x73   :  { %654 = vmatpush.msrb.mxu0 %v416_v42  ;;  %1059 = vmatmul.msk.f32.vlgmr.msrb.gmra.mxu2 %vm424_vm0, %v1384_v27  ;;  %v298_v42 = vld [vmem:[#allocation10 + $0x278] sm:$0xff] }
  0x74   :  { %674 = vmatpush.msrb.mxu1 %v289_v43  ;;  %734 = vmatpush.msrb.mxu2 %v418_v44  ;;  %v164_v43 = vld [vmem:[#allocation8 + $0x190] sm:$0xff]  ;;  %v141_v44 = vld [vmem:[#allocation8 + $0xd8] sm:$0xff] }
  0x75   :  { %786 = vmatpush.msrb.mxu3 %v154_v45  ;;  %1060 = vmatmul.msk.f32.vlgmr.msra.gmra.mxu1 %vm424_vm0, %v1384_v27  ;;  %v155_v45 = vld [vmem:[#allocation8 + $0x148] sm:$0xff] }
  0x76   :  { %655 = vmatpush.msrb.mxu0 %v408_v46  ;;  %675 = vmatpush.msrb.mxu1 %v281_v47  ;;  %v290_v46 = vld [vmem:[#allocation10 + $0x238] sm:$0xff]  ;;  %v156_v47 = vld [vmem:[#allocation8 + $0x150] sm:$0xff] }
  0x77   :  { %735 = vmatpush.msrb.mxu2 %v410_v48  ;;  %787 = vmatpush.msrb.mxu3 %v146_v49  ;;  %v133_v48 = vld [vmem:[#allocation8 + $0x98] sm:$0xff]  ;;  %v147_v49 = vld [vmem:[#allocation8 + $0x108] sm:$0xff] }
  0x78   :  { %656 = vmatpush.msrb.mxu0 %v400_v50  ;;  %1062 = vmatmul.msk.f32.vlgmr.msra.gmra.mxu3 %vm424_vm0, %v1384_v27  ;;  %v282_v50 = vld [vmem:[#allocation10 + $0x1f8] sm:$0xff] }
  0x79   :  { %676 = vmatpush.msrb.mxu1 %v273_v51  ;;  %736 = vmatpush.msrb.mxu2 %v402_v52  ;;  %v148_v51 = vld [vmem:[#allocation8 + $0x110] sm:$0xff]  ;;  %v125_v52 = vld [vmem:[#allocation8 + $0x58] sm:$0xff] }
  0x7a   :  { %788 = vmatpush.msrb.mxu3 %v138_v53  ;;  %657 = vmatpush.msrb.mxu0 %v392_v54  ;;  %v274_v53 = vld [vmem:[#allocation10 + $0x1b8] sm:$0xff]  ;;  %v139_v54 = vld [vmem:[#allocation8 + $0xc8] sm:$0xff] }
  0x7b   :  { %677 = vmatpush.msrb.mxu1 %v265_v55  ;;  %737 = vmatpush.msrb.mxu2 %v394_v56  ;;  %v140_v55 = vld [vmem:[#allocation8 + $0xd0] sm:$0xff]  ;;  %v117_v56 = vld [vmem:[#allocation8 + $0x18] sm:$0xff] }
  0x7c   :  { %789 = vmatpush.msrb.mxu3 %v130_v57  ;;  %658 = vmatpush.msrb.mxu0 %v384_v58  ;;  %v266_v57 = vld [vmem:[#allocation10 + $0x178] sm:$0xff] }
  0x7d   :  { %678 = vmatpush.msrb.mxu1 %v257_v59  ;;  %738 = vmatpush.msrb.mxu2 %v386_v60  ;;  %v217_v58 = vld [vmem:[#allocation8 + $0x338] sm:$0xf]  ;;  %v131_v59 = vld [vmem:[#allocation8 + $0x88] sm:$0xff]  ;;  %v132_v60 = vld [vmem:[#allocation8 + $0x90] sm:$0xff] }
  0x7e   :  { %790 = vmatpush.msrb.mxu3 %v122_v61  ;;  %659 = vmatpush.msrb.mxu0 %v376_v62  ;;  %v258_v61 = vld [vmem:[#allocation10 + $0x138] sm:$0xff] }
  0x7f   :  { %679 = vmatpush.msrb.mxu1 %v249_v63  ;;  %739 = vmatpush.msrb.mxu2 %v378_v0  ;;  %v209_v62 = vld [vmem:[#allocation8 + $0x2f8] sm:$0xff]  ;;  %v123_v63 = vld [vmem:[#allocation8 + $0x48] sm:$0xff]  ;;  %v124_v0 = vld [vmem:[#allocation8 + $0x50] sm:$0xff] }
  0x80   :  { %791 = vmatpush.msrb.mxu3 %v114_v1  ;;  %563 = vmatmul.f32.vlgmr.msra.gmra.mxu0 %v1382_v26  ;;  %v201_v1 = vld [vmem:[#allocation8 + $0x2b8] sm:$0xff] }
  0x81   :  { %1065 = vmatmul.msk.f32.vlgmr.msrb.gmra.mxu3 %vm747_vm2, %v1403_v2  ;;  %660 = vmatpush.msrb.mxu0 %v368_v4  ;;  %v116_v4 = vld [vmem:[#allocation8 + $0x10] sm:$0xff] }
  0x82   :  { %1070 = vmatpush.msk.msra.mxu3 %vm751_vm1, %v213_v3  ;;  %680 = vmatpush.msrb.mxu1 %v241_v5  ;;  %v115_v3 = vld [vmem:[#allocation8 + $0x8] sm:$0xff] }
  0x83   :  { %740 = vmatpush.msrb.mxu2 %v370_v6  ;;  %661 = vmatpush.msrb.mxu0 %v360_v8  ;;  %v215_v5 = vld [vmem:[#allocation8 + $0x328] sm:$0xf]  ;;  %v216_v6 = vld [vmem:[#allocation8 + $0x330] sm:$0xf]  ;;  %v242_v8 = vld [vmem:[#allocation10 + $0xb8] sm:$0xff] }
  0x84   :  { %840 = vmatpush.msra.mxu3 %v205_v7  ;;  %681 = vmatpush.msrb.mxu1 %v233_v9  ;;  %v193_v7 = vld [vmem:[#allocation8 + $0x278] sm:$0xff]  ;;  %v207_v9 = vld [vmem:[#allocation8 + $0x2e8] sm:$0xff] }
  0x85   :  { %741 = vmatpush.msrb.mxu2 %v362_v10  ;;  %662 = vmatpush.msrb.mxu0 %v352_v12  ;;  %v208_v10 = vld [vmem:[#allocation8 + $0x2f0] sm:$0xff]  ;;  %v234_v12 = vld [vmem:[#allocation10 + $0x78] sm:$0xff] }
  0x86   :  { %841 = vmatpush.msra.mxu3 %v197_v11  ;;  %682 = vmatpush.msrb.mxu1 %v225_v13  ;;  %v185_v11 = vld [vmem:[#allocation8 + $0x238] sm:$0xff]  ;;  %v199_v13 = vld [vmem:[#allocation8 + $0x2a8] sm:$0xff] }
  0x87   :  { %742 = vmatpush.msrb.mxu2 %v354_v14  ;;  %707 = vmatpush.msra.mxu0 %v346_v15  ;;  %v200_v14 = vld [vmem:[#allocation8 + $0x2b0] sm:$0xff]  ;;  %v177_v15 = vld [vmem:[#allocation8 + $0x1f8] sm:$0xff] }
  0x88   :  { %643 = vmatmul.f32.vlgmr.msra.gmra.mxu2 %v1382_v26  ;;  %1066 = vmatpush.msk.msra.mxu1 %vm751_vm1, %v211_v16  ;;  %v226_v16 = vld [vmem:[#allocation10 + $0x38] sm:$0xff] }
  0x89   :  { %1068 = vmatpush.msk.msra.mxu2 %vm751_vm1, %v212_v17  ;;  %842 = vmatpush.msra.mxu3 %v189_v18  ;;  %v191_v17 = vld [vmem:[#allocation8 + $0x268] sm:$0xff]  ;;  %v214_v18 = vld [vmem:[#allocation8 + $0x320] sm:$0xf] }
  0x8a   :  { %708 = vmatpush.msra.mxu0 %v338_v19  ;;  %800 = vmatpush.msra.mxu1 %v203_v20  ;;  %v192_v19 = vld [vmem:[#allocation8 + $0x270] sm:$0xff]  ;;  %v169_v20 = vld [vmem:[#allocation8 + $0x1b8] sm:$0xff] }
  0x8b   :  { %820 = vmatpush.msra.mxu2 %v204_v21  ;;  %843 = vmatpush.msra.mxu3 %v181_v22  ;;  %v183_v21 = vld [vmem:[#allocation8 + $0x228] sm:$0xff]  ;;  %v206_v22 = vld [vmem:[#allocation8 + $0x2e0] sm:$0xff] }
  0x8c   :  { %709 = vmatpush.msra.mxu0 %v330_v23  ;;  %801 = vmatpush.msra.mxu1 %v195_v24  ;;  %v184_v23 = vld [vmem:[#allocation8 + $0x230] sm:$0xff]  ;;  %v161_v24 = vld [vmem:[#allocation8 + $0x178] sm:$0xff] }
  0x8d   :  { %821 = vmatpush.msra.mxu2 %v196_v25  ;;  %844 = vmatpush.msra.mxu3 %v173_v28  ;;  %v175_v25 = vld [vmem:[#allocation8 + $0x1e8] sm:$0xff]  ;;  %v198_v28 = vld [vmem:[#allocation8 + $0x2a0] sm:$0xff] }
  0x8e   :  { %710 = vmatpush.msra.mxu0 %v322_v29  ;;  %802 = vmatpush.msra.mxu1 %v187_v30  ;;  %v176_v29 = vld [vmem:[#allocation8 + $0x1f0] sm:$0xff]  ;;  %v153_v30 = vld [vmem:[#allocation8 + $0x138] sm:$0xff] }
  0x8f   :  { %822 = vmatpush.msra.mxu2 %v188_v31  ;;  %845 = vmatpush.msra.mxu3 %v165_v32  ;;  %v190_v31 = vld [vmem:[#allocation8 + $0x260] sm:$0xff]  ;;  %v167_v32 = vld [vmem:[#allocation8 + $0x1a8] sm:$0xff] }
  0x90   :  { %711 = vmatpush.msra.mxu0 %v314_v33  ;;  %803 = vmatpush.msra.mxu1 %v179_v34  ;;  %v168_v33 = vld [vmem:[#allocation8 + $0x1b0] sm:$0xff]  ;;  %v145_v34 = vld [vmem:[#allocation8 + $0xf8] sm:$0xff] }
  0x91   :  { %823 = vmatpush.msra.mxu2 %v180_v35  ;;  %846 = vmatpush.msra.mxu3 %v157_v36  ;;  %v182_v35 = vld [vmem:[#allocation8 + $0x220] sm:$0xff]  ;;  %v159_v36 = vld [vmem:[#allocation8 + $0x168] sm:$0xff] }
  0x92   :  { %683 = vmatmul.f32.vlgmr.msrb.gmra.mxu1 %v1382_v26  ;;  %712 = vmatpush.msra.mxu0 %v306_v37  ;;  %v160_v37 = vld [vmem:[#allocation8 + $0x170] sm:$0xff] }
  0x93   :  { %804 = vmatpush.msra.mxu1 %v171_v38  ;;  %824 = vmatpush.msra.mxu2 %v172_v39  ;;  %v137_v38 = vld [vmem:[#allocation8 + $0xb8] sm:$0xff]  ;;  %v174_v39 = vld [vmem:[#allocation8 + $0x1e0] sm:$0xff] }
  0x94   :  { %847 = vmatpush.msra.mxu3 %v149_v40  ;;  %1061 = vmatmul.msk.f32.vlgmr.msrb.gmra.mxu0 %vm424_vm0, %v1384_v27  ;;  %v151_v40 = vld [vmem:[#allocation8 + $0x128] sm:$0xff] }
  0x95   :  { %805 = vmatpush.msra.mxu1 %v163_v41  ;;  %713 = vmatpush.msra.mxu0 %v298_v42  ;;  %v152_v41 = vld [vmem:[#allocation8 + $0x130] sm:$0xff]  ;;  %v129_v42 = vld [vmem:[#allocation8 + $0x78] sm:$0xff] }
  0x96   :  { %825 = vmatpush.msra.mxu2 %v164_v43  ;;  %848 = vmatpush.msra.mxu3 %v141_v44  ;;  %v166_v43 = vld [vmem:[#allocation8 + $0x1a0] sm:$0xff]  ;;  %v143_v44 = vld [vmem:[#allocation8 + $0xe8] sm:$0xff] }
  0x97   :  { %806 = vmatpush.msra.mxu1 %v155_v45  ;;  %714 = vmatpush.msra.mxu0 %v290_v46  ;;  %v121_v45 = vld [vmem:[#allocation8 + $0x38] sm:$0xff]  ;;  %v158_v46 = vld [vmem:[#allocation8 + $0x160] sm:$0xff] }
  0x98   :  { %826 = vmatpush.msra.mxu2 %v156_v47  ;;  %849 = vmatpush.msra.mxu3 %v133_v48  ;;  %v135_v47 = vld [vmem:[#allocation8 + $0xa8] sm:$0xff]  ;;  %v136_v48 = vld [vmem:[#allocation8 + $0xb0] sm:$0xff] }
  0x99   :  { %807 = vmatpush.msra.mxu1 %v147_v49  ;;  %715 = vmatpush.msra.mxu0 %v282_v50  ;;  %v150_v49 = vld [vmem:[#allocation8 + $0x120] sm:$0xff]  ;;  %v127_v50 = vld [vmem:[#allocation8 + $0x68] sm:$0xff] }
  0x9a   :  { %827 = vmatpush.msra.mxu2 %v148_v51  ;;  %850 = vmatpush.msra.mxu3 %v125_v52  ;;  %v128_v51 = vld [vmem:[#allocation8 + $0x70] sm:$0xff]  ;;  %v142_v52 = vld [vmem:[#allocation8 + $0xe0] sm:$0xff] }
  0x9b   :  { %1063 = vmatmul.msk.f32.vlgmr.msrb.gmra.mxu2 %vm424_vm0, %v1384_v27  ;;  %716 = vmatpush.msra.mxu0 %v274_v53  ;;  %v250_v27 = vld [vmem:[#allocation10 + $0xf8] sm:$0xff]  ;;  %v119_v53 = vld [vmem:[#allocation8 + $0x28] sm:$0xff] }
  0x9c   :  { %808 = vmatpush.msra.mxu1 %v139_v54  ;;  %828 = vmatpush.msra.mxu2 %v140_v55  ;;  %v120_v54 = vld [vmem:[#allocation8 + $0x30] sm:$0xff]  ;;  %v134_v55 = vld [vmem:[#allocation8 + $0xa0] sm:$0xff] }
  0x9d   :  { %851 = vmatpush.msra.mxu3 %v117_v56  ;;  %717 = vmatpush.msra.mxu0 %v266_v57  ;;  %v126_v56 = vld [vmem:[#allocation8 + $0x60] sm:$0xff] }
  0x9e   :  { %1071 = vmatmul.msk.f32.vlgmr.msra.gmra.mxu3 %vm747_vm2, %v1403_v2  ;;  %809 = vmatpush.msra.mxu1 %v131_v59  ;;  %v118_v57 = vld [vmem:[#allocation8 + $0x20] sm:$0xff] }
  0x9f   :  { %1078 = vmatpush.msk.msrb.mxu3 %vm751_vm1, %v217_v58  ;;  %829 = vmatpush.msra.mxu2 %v132_v60 }
  0xa0   :  { %718 = vmatpush.msra.mxu0 %v258_v61  ;;  %810 = vmatpush.msra.mxu1 %v123_v63 }
  0xa1   :  { %920 = vmatpush.msrb.mxu3 %v209_v62  ;;  %830 = vmatpush.msra.mxu2 %v124_v0 }
  0xa2   :  { %719 = vmatpush.msra.mxu0 %v250_v27  ;;  %811 = vmatpush.msra.mxu1 %v115_v3 }
  0xa3   :  { %921 = vmatpush.msrb.mxu3 %v201_v1  ;;  %831 = vmatpush.msra.mxu2 %v116_v4 }
  0xa4   :  { %1067 = vmatmul.msk.f32.vlgmr.msra.gmra.mxu1 %vm747_vm2, %v1403_v2  ;;  %1069 = vmatmul.msk.f32.vlgmr.msra.gmra.mxu2 %vm747_vm2, %v1403_v2 }
  0xa5   :  { %1074 = vmatpush.msk.msrb.mxu1 %vm751_vm1, %v215_v5  ;;  %1076 = vmatpush.msk.msrb.mxu2 %vm751_vm1, %v216_v6 }
  0xa6   :  { %922 = vmatpush.msrb.mxu3 %v193_v7  ;;  %720 = vmatpush.msra.mxu0 %v242_v8 }
  0xa7   :  { %880 = vmatpush.msrb.mxu1 %v207_v9  ;;  %900 = vmatpush.msrb.mxu2 %v208_v10 }
  0xa8   :  { %923 = vmatpush.msrb.mxu3 %v185_v11  ;;  %721 = vmatpush.msra.mxu0 %v234_v12  ;;  %v936_v11 = vld [vmem:[#allocation11] sm:$0xff] }
  0xa9   :  { %881 = vmatpush.msrb.mxu1 %v199_v13  ;;  %901 = vmatpush.msrb.mxu2 %v200_v14  ;;  %v941_v14 = vperm.slane %v936_v11, 3 }
  0xaa   :  { %924 = vmatpush.msrb.mxu3 %v177_v15  ;;  %722 = vmatpush.msra.mxu0 %v226_v16  ;;  %v939_v16 = vperm.slane %v936_v11, 1 }
  0xab   :  { %882 = vmatpush.msrb.mxu1 %v191_v17  ;;  %902 = vmatpush.msrb.mxu2 %v192_v19 }
  0xac   :  { %1072 = vmatpush.msk.msrb.mxu0 %vm751_vm1, %v214_v18  ;;  %925 = vmatpush.msrb.mxu3 %v169_v20 }
  0xad   :  { %883 = vmatpush.msrb.mxu1 %v183_v21  ;;  %903 = vmatpush.msrb.mxu2 %v184_v23 }
  0xae   :  { %860 = vmatpush.msrb.mxu0 %v206_v22  ;;  %926 = vmatpush.msrb.mxu3 %v161_v24  ;;  %v940_v24 = vperm.slane %v936_v11, 2 }
  0xaf   :  { %884 = vmatpush.msrb.mxu1 %v175_v25  ;;  %904 = vmatpush.msrb.mxu2 %v176_v29 }
  0xb0   :  { %861 = vmatpush.msrb.mxu0 %v198_v28  ;;  %927 = vmatpush.msrb.mxu3 %v153_v30  ;;  %v938_v28 = vperm.slane %v936_v11, 0 }
  0xb1   :  { %723 = vmatmul.f32.vlgmr.msra.gmra.mxu0 %v1382_v26  ;;  %885 = vmatpush.msrb.mxu1 %v167_v32  ;;  %v144_v26 = vld [vmem:[#allocation8 + $0xf0] sm:$0xff] }
  0xb2   :  { %862 = vmatpush.msrb.mxu0 %v190_v31  ;;  %905 = vmatpush.msrb.mxu2 %v168_v33 }
  0xb3   :  { %928 = vmatpush.msrb.mxu3 %v145_v34  ;;  %886 = vmatpush.msrb.mxu1 %v159_v36 }
  0xb4   :  { %863 = vmatpush.msrb.mxu0 %v182_v35  ;;  %906 = vmatpush.msrb.mxu2 %v160_v37 }
  0xb5   :  { %929 = vmatpush.msrb.mxu3 %v137_v38  ;;  %887 = vmatpush.msrb.mxu1 %v151_v40  ;;  %v943_v38 = vperm.slane %v936_v11, 5 }
  0xb6   :  { %864 = vmatpush.msrb.mxu0 %v174_v39  ;;  %907 = vmatpush.msrb.mxu2 %v152_v41  ;;  %v945_v39 = vperm.slane %v936_v11, 7 }
  0xb7   :  { %930 = vmatpush.msrb.mxu3 %v129_v42  ;;  %888 = vmatpush.msrb.mxu1 %v143_v44 }
  0xb8   :  { %865 = vmatpush.msrb.mxu0 %v166_v43  ;;  %908 = vmatpush.msrb.mxu2 %v144_v26 }
  0xb9   :  { %931 = vmatpush.msrb.mxu3 %v121_v45  ;;  %889 = vmatpush.msrb.mxu1 %v135_v47 }
  0xba   :  { %1079 = vmatmul.msk.f32.vlgmr.msrb.gmra.mxu3 %vm747_vm2, %v1403_v2  ;;  %866 = vmatpush.msrb.mxu0 %v158_v46 }
  0xbb   :  { %909 = vmatpush.msrb.mxu2 %v136_v48  ;;  %890 = vmatpush.msrb.mxu1 %v127_v50  ;;  %v942_v50 = vperm.slane %v936_v11, 4 }
  0xbc   :  { %867 = vmatpush.msrb.mxu0 %v150_v49 }
  0xbd   :  { %910 = vmatpush.msrb.mxu2 %v128_v51  ;;  %891 = vmatpush.msrb.mxu1 %v119_v53  ;;  %v944_v51 = vperm.slane %v936_v11, 6 }
  0xbe   :  { %868 = vmatpush.msrb.mxu0 %v142_v52  ;;  %1075 = vmatmul.msk.f32.vlgmr.msrb.gmra.mxu1 %vm747_vm2, %v1403_v2 }
  0xbf   :  { %911 = vmatpush.msrb.mxu2 %v120_v54 }
  0xc0   :  { %1077 = vmatmul.msk.f32.vlgmr.msrb.gmra.mxu2 %vm747_vm2, %v1403_v2  ;;  %869 = vmatpush.msrb.mxu0 %v134_v55 }
  0xc2   :  { %870 = vmatpush.msrb.mxu0 %v126_v56 }
  0xc4   :  { %871 = vmatpush.msrb.mxu0 %v118_v57 }
  0xc5   :  { %1073 = vmatmul.msk.f32.vlgmr.msrb.gmra.mxu0 %vm747_vm2, %v1403_v2 }
  0xcc   :  { %v464_v59 = vpop.f32.mrf.mxu1 }
  0xcd   :  { %v444_v0 = vpop.f32.mrf.mxu0 }
  0xce   :  { %v465_v20 = vadd.f32 %v464_v59, %v444_v0 }
  0xd3   :  { %v484_v60 = vpop.f32.mrf.mxu2 }
  0xd4   :  { %v544_v58 = vpop.f32.mrf.mxu3 }
  0xda   :  { %v504_v4 = vpop.f32.mrf.mxu0 }
  0xdb   :  { %v505_v2 = vadd.f32 %v504_v4, %v484_v60 }
  0xdf   :  { %v524_v62 = vpop.f32.mrf.mxu1 }
  0xe0   :  { %v545_v18 = vadd.f32 %v544_v58, %v524_v62  ;;  %v992_v62 = vld.sshfl [vmem:[#allocation1 + $0x8] sm:$0xff pattern:$0x73625140] }
  0xe8   :  { %v604_v61 = vpop.f32.mrf.mxu3 }
  0xf2   :  { %v624_v1 = vpop.f32.mrf.mxu1 }
  0xf3   :  { %v625_v47 = vadd.f32 %v624_v1, %v604_v61 }
  0xf6   :  { %v584_v63 = vpop.f32.mrf.mxu2 }
  0xfb   :  { %v704_v27 = vpop.f32.mrf.mxu3 }
  0xfd   :  { %v564_v8 = vpop.f32.mrf.mxu0 }
  0xfe   :  { %v585_v10 = vadd.f32 %v584_v63, %v564_v8 }
 0x104   :  { %v793_v5 = vpop.f32.mrf.mxu3 }
 0x105   :  { %v794_v25 = vadd.f32 %v793_v5, %v465_v20 }
 0x107   :  { %v954_v32 = vadd.f32 %v938_v28, %v794_v25 }
 0x109   :  { %v962_v35 = vmul.f32 0.5, %v954_v32 }
 0x10b   :  { %v644_v3 = vpop.f32.mrf.mxu2 }
 0x10f   :  { %v684_v6 = vpop.f32.mrf.mxu1 }
 0x110   :  { %v705_v49 = vadd.f32 %v704_v27, %v684_v6 }
 0x111   :  { %v664_v21 = vpop.f32.mrf.mxu0 }
 0x112   :  { %v665_v36 = vadd.f32 %v664_v21, %v644_v3 }
 0x11e   :  { %v744_v7 = vpop.f32.mrf.mxu2 }
 0x121   :  { %v853_v9 = vpop.f32.mrf.mxu3  ;;  %v813_v12 = vpop.f32.mrf.mxu1 }
 0x122   :  { %v854_v13 = vadd.f32 %v853_v9, %v585_v10  ;;  %v814_v15 = vadd.f32 %v813_v12, %v505_v2  ;;  %v991_v9 = vld.sshfl [vmem:[#allocation1] sm:$0xff pattern:$0x73625140] }
 0x124   :  { %v957_v19 = vadd.f32 %v941_v14, %v854_v13  ;;  %v955_v22 = vadd.f32 %v939_v16, %v814_v15 }
 0x126   :  { %v971_v29 = vmul.f32 0.5, %v957_v19  ;;  %v963_v30 = vmul.f32 0.5, %v955_v22 }
 0x127   :  { %v833_v17 = vpop.f32.mrf.mxu2 }
 0x128   :  { %v834_v23 = vadd.f32 %v833_v17, %v545_v18  ;;  %1090 = vtanh.f32 %v971_v29 }
 0x129   :  { %1092 = vtanh.f32 %v963_v30 }
 0x12a   :  { %v956_v31 = vadd.f32 %v940_v24, %v834_v23 }
 0x12c   :  { %v970_v34 = vmul.f32 0.5, %v956_v31 }
 0x12e   :  { %v724_v33 = vpop.f32.mrf.mxu0  ;;  %v1091_v42 = vpop.eup %1090  ;;  %1094 = vtanh.f32 %v970_v34 }
 0x12f   :  { %v745_v37 = vadd.f32 %v744_v7, %v724_v33  ;;  %v1093_v26 = vpop.eup %1092  ;;  %1096 = vtanh.f32 %v962_v35  ;;  %v975_v48 = vmul.f32 0.5, %v1091_v42 }
 0x130   :  { %v967_v52 = vmul.f32 0.5, %v1093_v26 }
 0x131   :  { %v977_v59 = vadd.f32 0.5, %v975_v48 }
 0x132   :  { %v969_v3 = vadd.f32 0.5, %v967_v52 }
 0x133   :  { %v996_v5 = vmul.f32 %v992_v62, %v977_v59 }
 0x134   :  { %v1095_v56 = vpop.eup %1094 }
 0x135   :  { %v1097_v60 = vpop.eup %1096  ;;  %v974_v4 = vmul.f32 0.5, %v1095_v56 }
 0x136   :  { %v966_v1 = vmul.f32 0.5, %v1097_v60 }
 0x137   :  { %v976_v7 = vadd.f32 0.5, %v974_v4 }
 0x138   :  { %v968_v11 = vadd.f32 0.5, %v966_v1 }
 0x139   :  { %v995_v2 = vmul.f32 %v991_v9, %v976_v7 }
 0x13b   :  { %v893_v40 = vpop.f32.mrf.mxu1 }
 0x13c   :  { %v894_v43 = vadd.f32 %v893_v40, %v665_v36 }
 0x13d   :  { %v933_v41 = vpop.f32.mrf.mxu3 }
 0x13e   :  { %v934_v44 = vadd.f32 %v933_v41, %v745_v37  ;;  %v959_v45 = vadd.f32 %v943_v38, %v894_v43 }
 0x140   :  { %v961_v46 = vadd.f32 %v945_v39, %v934_v44  ;;  %1098 = vtanh.f32 %v959_v45 }
 0x142   :  { %v981_v53 = vmul.f32 0.5, %v961_v46  ;;  %v873_v54 = vpop.f32.mrf.mxu0 }
 0x143   :  { %v913_v55 = vpop.f32.mrf.mxu2  ;;  %v874_v57 = vadd.f32 %v873_v54, %v625_v47 }
 0x144   :  { %v914_v58 = vadd.f32 %v913_v55, %v705_v49  ;;  %1100 = vtanh.f32 %v981_v53 }
 0x145   :  { %v958_v63 = vadd.f32 %v942_v50, %v874_v57 }
 0x146   :  { %v960_v0 = vadd.f32 %v944_v51, %v914_v58  ;;  %v1099_v61 = vpop.eup %1098 }
 0x147   :  { %1102 = vtanh.f32 %v958_v63  ;;  %v998_v6 = vmul.f32 %v1099_v61, %v969_v3 }
 0x148   :  { %v980_v27 = vmul.f32 0.5, %v960_v0 }
 0x149   :  { %v1000_v8 = vadd.f32 %v998_v6, %v996_v5 }
 0x14a   :  { %1104 = vtanh.f32 %v980_v27  ;;  %v1101_v10 = vpop.eup %1100 }
 0x14b   :  { %1106 = vtanh.f32 %v1000_v8  ;;  %v985_v14 = vmul.f32 0.5, %v1101_v10  ;;  %v1003_v18 = vrot.slane %v1000_v8, 6 }
 0x14d   :  { %v1103_v12 = vpop.eup %1102  ;;  %v987_v21 = vadd.f32 0.5, %v985_v14 }
 0x14e   :  { %v997_v13 = vmul.f32 %v1103_v12, %v968_v11 }
 0x150   :  { %v1105_v15 = vpop.eup %1104  ;;  %v999_v16 = vadd.f32 %v997_v13, %v995_v2 }
 0x151   :  { %v1107_v19 = vpop.eup %1106  ;;  %v984_v22 = vmul.f32 0.5, %v1105_v15 }
 0x152   :  { %1108 = vtanh.f32 %v999_v16  ;;  %v1005_v20 = vsel %vm1004_vm3, %v999_v16, %v1003_v18  ;;  %v1013_v23 = vmul.f32 %v1107_v19, %v987_v21 }
 0x153   :  { %1009 = vst.msk [vmem:[#allocation14] sm:$0xf] %vm1440_vm5, %v1005_v20  ;;  %v986_v24 = vadd.f32 0.5, %v984_v22 }
 0x154   :  { %1041 = dma.vmem_to_hbm [thread:$0]  %s1037_s5, 64, %s1039_s8, [#allocation15]   ;;  %v1016_v28 = vrot.slane %v1013_v23, 6 }
 0x158   :  { %v1109_v25 = vpop.eup %1108 }
 0x159   :  { %v1012_v29 = vmul.f32 %v1109_v25, %v986_v24 }
 0x15b   :  { %v1017_v30 = vsel %vm1004_vm3, %v1012_v29, %v1016_v28 }
 0x15c   :  { %1019 = vst.msk [vmem:[#allocation13] sm:$0xf] %vm1440_vm5, %v1017_v30 }
 0x15d   :  { %1030 = dma.vmem_to_hbm [thread:$0]  %s1026_s9, 64, %s1028_s12, [#allocation4]  }
 0x15e   :  { %1310 = dma.done.wait [#allocation4], 64  }
 0x15f   :  { %1311 = vsyncadd [#allocation4], 4294967232 }
 0x160   :  { %1312 = dma.done.wait [#allocation15], 64  }
 0x161   :  { %1313 = vsyncadd [#allocation15], 4294967232 }
 0x162   :  { %1050 = vsyncpa [#allocation3], 1 }
 0x163   :  { %1051 = vsyncpa [#allocation6], 1 }
 0x164   :  { %1052 = vsyncpa [#allocation9], 1 }
 0x165   :  { %1053 = vsyncpa [#allocation12], 1 }
 0x166   :  { %1054 = vsyncpa [#allocation4], 1 }
 0x167   :  { %1055 = vsyncpa [#allocation15], 1 }

</bundles_post_ra>
